<compile_context>
chip_gen: v7x
topology: tpu7x:2x2x1
jax: 0.10.0
libtpu: 0.0.40
codegen_flags: <defaults>
</compile_context>

<pallas_src>
import functools

import jax
import jax.numpy as jnp
from jax.experimental import pallas as pl
from jax.experimental.pallas import tpu as pltpu


# ----------------------------------------------------------------------------
# Kernel: one batch tile (lanes) per grid step, all weights resident in VMEM.
# Everything is feature-major: arrays are (features, batch_tile).
# ----------------------------------------------------------------------------
def cvae_kernel(xc_ref, c_ref, eps_ref,
                w1_ref, w2_ref, w3_ref, w4z_ref, w4c_ref, w5_ref, w6_ref,
                bias_ref,
                recon_ref, mu_ref, lv_ref,
                *, x_dim, c_dim, z_dim, h_dim1, h_dim2):
    f32 = jnp.float32

    def mm(w_ref, act):
        # MXU matmul; activations cast to the (possibly bf16) weight dtype,
        # accumulation always in f32.
        return jnp.dot(w_ref[...], act.astype(w_ref.dtype),
                       preferred_element_type=f32)

    # Bias column slab (f32); all offsets are multiples of 8 sublanes.
    bias = bias_ref[...]                          # (2*h1 + 2*h2 + 2*z + x, 1)
    o = 0
    b1 = bias[o:o + h_dim1];     o += h_dim1
    b2 = bias[o:o + h_dim2];     o += h_dim2
    b3 = bias[o:o + 2 * z_dim];  o += 2 * z_dim   # [b31 ; b32]
    b4 = bias[o:o + h_dim2];     o += h_dim2
    b5 = bias[o:o + h_dim1];     o += h_dim1
    b6 = bias[o:o + x_dim]

    xc = xc_ref[...]                              # (x + c, tile_b)  pre-concat
    c = c_ref[...]                                # (c,     tile_b)
    eps = eps_ref[...]                            # (z,     tile_b)

    # ----- encoder -----
    h = jnp.maximum(mm(w1_ref, xc) + b1, 0.0)     # fc1 + relu
    h = jnp.maximum(mm(w2_ref, h) + b2, 0.0)      # fc2 + relu
    mu_lv = mm(w3_ref, h) + b3                    # fused fc31/fc32: (2z, tb)
    mu = mu_lv[:z_dim]
    log_var = mu_lv[z_dim:]

    # ----- sampling: z = mu + exp(0.5*log_var) * eps (all f32, EUP exp) -----
    z = mu + jnp.exp(0.5 * log_var) * eps

    # ----- decoder (fc4 split by columns: no concat([z, c])) -----
    h = jnp.maximum(mm(w4z_ref, z) + mm(w4c_ref, c) + b4, 0.0)
    h = jnp.maximum(mm(w5_ref, h) + b5, 0.0)
    recon = jax.nn.sigmoid(mm(w6_ref, h) + b6)

    # Three lane-dense output slabs (unmasked stores).
    recon_ref[...] = recon.astype(recon_ref.dtype)
    mu_ref[...] = mu.astype(mu_ref.dtype)
    lv_ref[...] = log_var.astype(lv_ref.dtype)


# ----------------------------------------------------------------------------
# Parameter handling (done ONCE, outside the jitted forward)
# ----------------------------------------------------------------------------
def init_params(key, x_dim, h_dim1, h_dim2, z_dim, c_dim):
    """Deterministic synthetic params, PyTorch nn.Linear convention:
    weight (out, in), bias (out,)."""
    shapes = {
        "fc1": (h_dim1, x_dim + c_dim),
        "fc2": (h_dim2, h_dim1),
        "fc31": (z_dim, h_dim2),
        "fc32": (z_dim, h_dim2),
        "fc4": (h_dim2, z_dim + c_dim),
        "fc5": (h_dim1, h_dim2),
        "fc6": (x_dim, h_dim1),
    }
    params = {}
    for name, (out_d, in_d) in shapes.items():
        key, kw, kb = jax.random.split(key, 3)
        bound = 1.0 / jnp.sqrt(in_d)
        params[name + "_w"] = jax.random.uniform(
            kw, (out_d, in_d), jnp.float32, -bound, bound)
        params[name + "_b"] = jax.random.uniform(
            kb, (out_d,), jnp.float32, -bound, bound)
    return params


def pack_params(params, matmul_dtype=jnp.float32):
    """Keep weights in (out, in) form (feature-major needs no transposes),
    fuse fc31/fc32, split fc4, pack biases into one column.  Optionally cast
    the matmul operands (weights) to bf16 for the v6e/v7x MXU; biases and all
    elementwise math stay f32."""
    z_dim = params["fc31_w"].shape[0]
    cast = lambda w: w.astype(matmul_dtype)
    bias = jnp.concatenate([
        params["fc1_b"], params["fc2_b"],
        params["fc31_b"], params["fc32_b"],
        params["fc4_b"], params["fc5_b"], params["fc6_b"],
    ]).astype(jnp.float32)[:, None]                               # (240, 1)
    return {
        "w1": cast(params["fc1_w"]),                              # (h1, x+c)
        "w2": cast(params["fc2_w"]),                              # (h2, h1)
        "w3": cast(jnp.concatenate([params["fc31_w"],
                                    params["fc32_w"]], axis=0)),  # (2z, h2)
        "w4z": cast(params["fc4_w"][:, :z_dim]),                  # (h2, z)
        "w4c": cast(params["fc4_w"][:, z_dim:]),                  # (h2, c)
        "w5": cast(params["fc5_w"]),                              # (h1, h2)
        "w6": cast(params["fc6_w"]),                              # (x, h1)
        "bias": bias,
    }


# ----------------------------------------------------------------------------
# Forward wrapper
# ----------------------------------------------------------------------------
@functools.partial(
    jax.jit,
    static_argnames=("x_dim", "c_dim", "z_dim", "h_dim1", "h_dim2", "tile_b"))
def cvae_forward(x, c, eps, packed, *, x_dim, c_dim, z_dim, h_dim1, h_dim2,
                 tile_b=128):
    """Matches CVAE.forward(x, c) -> (recon, mu, log_var); eps is supplied
    instead of drawn by torch.randn_like for determinism."""
    x2d = x.reshape(-1, x_dim)                    # x.view(-1, in_dim)
    B = x2d.shape[0]

    # Feature-major ("batch on lanes") slabs; torch.cat([x, c], 1) is folded
    # here, outside the kernel (layout plumbing, not compute).
    xc_t = jnp.concatenate([x2d, c], axis=1).T.astype(jnp.float32)  # (x+c, B)
    c_t = c.T.astype(jnp.float32)                                   # (c, B)
    eps_t = eps.T.astype(jnp.float32)                               # (z, B)

    # Pad the batch (lane axis) to an EVEN number of tiles: lane-dense DMAs
    # and both v7x TensorCores get equal work.
    n_tiles = pl.cdiv(B, tile_b)
    n_tiles += n_tiles % 2
    Bp = n_tiles * tile_b
    if Bp != B:
        pad = ((0, 0), (0, Bp - B))
        xc_t = jnp.pad(xc_t, pad)
        c_t = jnp.pad(c_t, pad)
        eps_t = jnp.pad(eps_t, pad)

    kernel = functools.partial(
        cvae_kernel, x_dim=x_dim, c_dim=c_dim, z_dim=z_dim,
        h_dim1=h_dim1, h_dim2=h_dim2)

    def batch_tile(rows):                 # lane-dense batch tile
        return pl.BlockSpec((rows, tile_b), lambda i: (0, i))

    def resident(a):                      # grid-invariant: fetched once
        return pl.BlockSpec(a.shape, lambda i: (0, 0))

    recon_t, mu_t, lv_t = pl.pallas_call(
        kernel,
        out_shape=(jax.ShapeDtypeStruct((x_dim, Bp), jnp.float32),
                   jax.ShapeDtypeStruct((z_dim, Bp), jnp.float32),
                   jax.ShapeDtypeStruct((z_dim, Bp), jnp.float32)),
        grid=(n_tiles,),
        in_specs=[
            batch_tile(x_dim + c_dim),            # xc
            batch_tile(c_dim),                    # c
            batch_tile(z_dim),                    # eps
            resident(packed["w1"]), resident(packed["w2"]),
            resident(packed["w3"]), resident(packed["w4z"]),
            resident(packed["w4c"]), resident(packed["w5"]),
            resident(packed["w6"]), resident(packed["bias"]),
        ],
        out_specs=(batch_tile(x_dim), batch_tile(z_dim), batch_tile(z_dim)),
        compiler_params=pltpu.CompilerParams(
            dimension_semantics=("parallel",),
            vmem_limit_bytes=32 * 1024 * 1024),
    )(xc_t, c_t, eps_t,
      packed["w1"], packed["w2"], packed["w3"], packed["w4z"],
      packed["w4c"], packed["w5"], packed["w6"], packed["bias"])

    # Back to the PyTorch (batch, feature) convention; drop batch padding.
    return recon_t[:, :B].T, mu_t[:, :B].T, lv_t[:, :B].T


# ----------------------------------------------------------------------------
# Pure-JAX reference mirroring the PyTorch module
# ----------------------------------------------------------------------------
def cvae_forward_ref(x, c, eps, params, x_dim):
    def lin(name, v):
        return v @ params[name + "_w"].T + params[name + "_b"]
    x2d = x.reshape(-1, x_dim)
    h = jax.nn.relu(lin("fc1", jnp.concatenate([x2d, c], axis=1)))
    h = jax.nn.relu(lin("fc2", h))
    mu, log_var = lin("fc31", h), lin("fc32", h)
    z = mu + jnp.exp(0.5 * log_var) * eps
    h = jax.nn.relu(lin("fc4", jnp.concatenate([z, c], axis=1)))
    h = jax.nn.relu(lin("fc5", h))
    recon = jax.nn.sigmoid(lin("fc6", h))
    return recon, mu, log_var


if __name__ == "__main__":
    # Module-consistent feature dims; batch sized for 2 full 128-lane tiles
    # (even grid -> both TensorCores busy on v7x).
    B, X_DIM, H1, H2, Z_DIM, C_DIM = 256, 32, 64, 32, 8, 4

    key = jax.random.PRNGKey(0)
    kp, kx, kc, ke = jax.random.split(key, 4)

    params = init_params(kp, X_DIM, H1, H2, Z_DIM, C_DIM)

    x = jax.random.normal(kx, (B, X_DIM), jnp.float32)
    c = jax.random.normal(kc, (B, C_DIM), jnp.float32)
    eps = jax.random.normal(ke, (B, Z_DIM), jnp.float32)  # torch.randn_like(std)

    r_ref, mu_ref, lv_ref = cvae_forward_ref(x, c, eps, params, X_DIM)

    # ---- f32 MXU operands: exact parity with the reference ----
    packed = pack_params(params, jnp.float32)
    recon, mu, log_var = cvae_forward(
        x, c, eps, packed,
        x_dim=X_DIM, c_dim=C_DIM, z_dim=Z_DIM, h_dim1=H1, h_dim2=H2,
        tile_b=128)
    jax.block_until_ready((recon, mu, log_var))

    assert recon.shape == (B, X_DIM)
    assert mu.shape == (B, Z_DIM) and log_var.shape == (B, Z_DIM)
    assert jnp.allclose(recon, r_ref, atol=1e-4), "recon mismatch"
    assert jnp.allclose(mu, mu_ref, atol=1e-4), "mu mismatch"
    assert jnp.allclose(log_var, lv_ref, atol=1e-4), "log_var mismatch"

    # ---- bf16 MXU operands (v6e/v7x fast path), f32 elementwise/accum ----
    packed_bf16 = pack_params(params, jnp.bfloat16)
    recon_b, mu_b, lv_b = cvae_forward(
        x, c, eps, packed_bf16,
        x_dim=X_DIM, c_dim=C_DIM, z_dim=Z_DIM, h_dim1=H1, h_dim2=H2,
        tile_b=128)
    jax.block_until_ready((recon_b, mu_b, lv_b))
    assert jnp.allclose(recon_b, r_ref, atol=0.1, rtol=0.1), "bf16 recon mismatch"
    assert jnp.allclose(mu_b, mu_ref, atol=0.1, rtol=0.1), "bf16 mu mismatch"
    assert jnp.allclose(lv_b, lv_ref, atol=0.1, rtol=0.1), "bf16 log_var mismatch"

    print("KERNEL_OK")
</pallas_src>

<mosaic_0001>
module attributes {stable_mosaic.version = 11 : i64} {
  func.func @cvae_kernel(%arg0: i32, %arg1: memref<36x128xf32, #tpu.memory_space<vmem>>, %arg2: memref<4x128xf32, #tpu.memory_space<vmem>>, %arg3: memref<8x128xf32, #tpu.memory_space<vmem>>, %arg4: memref<64x36xf32, #tpu.memory_space<vmem>>, %arg5: memref<32x64xf32, #tpu.memory_space<vmem>>, %arg6: memref<16x32xf32, #tpu.memory_space<vmem>>, %arg7: memref<32x8xf32, #tpu.memory_space<vmem>>, %arg8: memref<32x4xf32, #tpu.memory_space<vmem>>, %arg9: memref<64x32xf32, #tpu.memory_space<vmem>>, %arg10: memref<32x64xf32, #tpu.memory_space<vmem>>, %arg11: memref<240x1xf32, #tpu.memory_space<vmem>>, %arg12: memref<32x128xf32, #tpu.memory_space<vmem>>, %arg13: memref<8x128xf32, #tpu.memory_space<vmem>>, %arg14: memref<8x128xf32, #tpu.memory_space<vmem>>) attributes {dimension_semantics = [#tpu.dimension_semantics<parallel>], iteration_bounds = array<i64: 2>, scalar_prefetch = 0 : i64, scratch_operands = 0 : i64, tpu.core_type = #tpu.core_type<tc>, window_params = [{transform_indices = @transform_0, window_bounds = array<i64: 36, 128>}, {transform_indices = @transform_1, window_bounds = array<i64: 4, 128>}, {transform_indices = @transform_2, window_bounds = array<i64: 8, 128>}, {pipeline_mode = #tpu.pipeline_mode<synchronous>, transform_indices = @transform_3, window_bounds = array<i64: 64, 36>}, {pipeline_mode = #tpu.pipeline_mode<synchronous>, transform_indices = @transform_4, window_bounds = array<i64: 32, 64>}, {pipeline_mode = #tpu.pipeline_mode<synchronous>, transform_indices = @transform_5, window_bounds = array<i64: 16, 32>}, {pipeline_mode = #tpu.pipeline_mode<synchronous>, transform_indices = @transform_6, window_bounds = array<i64: 32, 8>}, {pipeline_mode = #tpu.pipeline_mode<synchronous>, transform_indices = @transform_7, window_bounds = array<i64: 32, 4>}, {pipeline_mode = #tpu.pipeline_mode<synchronous>, transform_indices = @transform_8, window_bounds = array<i64: 64, 32>}, {pipeline_mode = #tpu.pipeline_mode<synchronous>, transform_indices = @transform_9, window_bounds = array<i64: 32, 64>}, {pipeline_mode = #tpu.pipeline_mode<synchronous>, transform_indices = @transform_10, window_bounds = array<i64: 240, 1>}, {transform_indices = @transform_11, window_bounds = array<i64: 32, 128>}, {transform_indices = @transform_12, window_bounds = array<i64: 8, 128>}, {transform_indices = @transform_13, window_bounds = array<i64: 8, 128>}]} {
    %c0 = arith.constant 0 : index
    %c0_0 = arith.constant 0 : index
    %0 = vector.load %arg11[%c0, %c0_0] : memref<240x1xf32, #tpu.memory_space<vmem>>, vector<240x1xf32>
    %1 = vector.extract_strided_slice %0 {offsets = [0, 0], sizes = [64, 1], strides = [1, 1]} : vector<240x1xf32> to vector<64x1xf32>
    %2 = vector.extract_strided_slice %0 {offsets = [64, 0], sizes = [32, 1], strides = [1, 1]} : vector<240x1xf32> to vector<32x1xf32>
    %3 = vector.extract_strided_slice %0 {offsets = [96, 0], sizes = [16, 1], strides = [1, 1]} : vector<240x1xf32> to vector<16x1xf32>
    %4 = vector.extract_strided_slice %0 {offsets = [112, 0], sizes = [32, 1], strides = [1, 1]} : vector<240x1xf32> to vector<32x1xf32>
    %5 = vector.extract_strided_slice %0 {offsets = [144, 0], sizes = [64, 1], strides = [1, 1]} : vector<240x1xf32> to vector<64x1xf32>
    %6 = vector.extract_strided_slice %0 {offsets = [208, 0], sizes = [32, 1], strides = [1, 1]} : vector<240x1xf32> to vector<32x1xf32>
    %c0_1 = arith.constant 0 : index
    %c0_2 = arith.constant 0 : index
    %7 = vector.load %arg1[%c0_1, %c0_2] : memref<36x128xf32, #tpu.memory_space<vmem>>, vector<36x128xf32>
    %c0_3 = arith.constant 0 : index
    %c0_4 = arith.constant 0 : index
    %8 = vector.load %arg2[%c0_3, %c0_4] : memref<4x128xf32, #tpu.memory_space<vmem>>, vector<4x128xf32>
    %c0_5 = arith.constant 0 : index
    %c0_6 = arith.constant 0 : index
    %9 = vector.load %arg3[%c0_5, %c0_6] : memref<8x128xf32, #tpu.memory_space<vmem>>, vector<8x128xf32>
    %c0_7 = arith.constant 0 : index
    %c0_8 = arith.constant 0 : index
    %10 = vector.load %arg4[%c0_7, %c0_8] : memref<64x36xf32, #tpu.memory_space<vmem>>, vector<64x36xf32>
    %cst = arith.constant dense<0.000000e+00> : vector<64x128xf32>
    %11 = tpu.matmul %10, %7, %cst {dimension_numbers = #tpu.dot_dimension_numbers<[1], [0], [0], [1], [0, 0, 1, 1], [], []>} : vector<64x36xf32>, vector<36x128xf32>, vector<64x128xf32> -> vector<64x128xf32>
    %12 = vector.broadcast %1 : vector<64x1xf32> to vector<64x128xf32>
    %13 = arith.addf %11, %12 : vector<64x128xf32>
    %cst_9 = arith.constant 0.000000e+00 : f32
    %14 = vector.broadcast %cst_9 : f32 to vector<64x128xf32>
    %15 = arith.maximumf %13, %14 : vector<64x128xf32>
    %c0_10 = arith.constant 0 : index
    %c0_11 = arith.constant 0 : index
    %16 = vector.load %arg5[%c0_10, %c0_11] : memref<32x64xf32, #tpu.memory_space<vmem>>, vector<32x64xf32>
    %cst_12 = arith.constant dense<0.000000e+00> : vector<32x128xf32>
    %17 = tpu.matmul %16, %15, %cst_12 {dimension_numbers = #tpu.dot_dimension_numbers<[1], [0], [0], [1], [0, 0, 1, 1], [], []>} : vector<32x64xf32>, vector<64x128xf32>, vector<32x128xf32> -> vector<32x128xf32>
    %18 = vector.broadcast %2 : vector<32x1xf32> to vector<32x128xf32>
    %19 = arith.addf %17, %18 : vector<32x128xf32>
    %cst_13 = arith.constant 0.000000e+00 : f32
    %20 = vector.broadcast %cst_13 : f32 to vector<32x128xf32>
    %21 = arith.maximumf %19, %20 : vector<32x128xf32>
    %c0_14 = arith.constant 0 : index
    %c0_15 = arith.constant 0 : index
    %22 = vector.load %arg6[%c0_14, %c0_15] : memref<16x32xf32, #tpu.memory_space<vmem>>, vector<16x32xf32>
    %cst_16 = arith.constant dense<0.000000e+00> : vector<16x128xf32>
    %23 = tpu.matmul %22, %21, %cst_16 {dimension_numbers = #tpu.dot_dimension_numbers<[1], [0], [0], [1], [0, 0, 1, 1], [], []>} : vector<16x32xf32>, vector<32x128xf32>, vector<16x128xf32> -> vector<16x128xf32>
    %24 = vector.broadcast %3 : vector<16x1xf32> to vector<16x128xf32>
    %25 = arith.addf %23, %24 : vector<16x128xf32>
    %26 = vector.extract_strided_slice %25 {offsets = [0, 0], sizes = [8, 128], strides = [1, 1]} : vector<16x128xf32> to vector<8x128xf32>
    %27 = vector.extract_strided_slice %25 {offsets = [8, 0], sizes = [8, 128], strides = [1, 1]} : vector<16x128xf32> to vector<8x128xf32>
    %cst_17 = arith.constant 5.000000e-01 : f32
    %28 = vector.broadcast %cst_17 : f32 to vector<8x128xf32>
    %29 = arith.mulf %28, %27 : vector<8x128xf32>
    %30 = math.exp %29 : vector<8x128xf32>
    %31 = arith.mulf %30, %9 : vector<8x128xf32>
    %32 = arith.addf %26, %31 : vector<8x128xf32>
    %c0_18 = arith.constant 0 : index
    %c0_19 = arith.constant 0 : index
    %33 = vector.load %arg7[%c0_18, %c0_19] : memref<32x8xf32, #tpu.memory_space<vmem>>, vector<32x8xf32>
    %cst_20 = arith.constant dense<0.000000e+00> : vector<32x128xf32>
    %34 = tpu.matmul %33, %32, %cst_20 {dimension_numbers = #tpu.dot_dimension_numbers<[1], [0], [0], [1], [0, 0, 1, 1], [], []>} : vector<32x8xf32>, vector<8x128xf32>, vector<32x128xf32> -> vector<32x128xf32>
    %c0_21 = arith.constant 0 : index
    %c0_22 = arith.constant 0 : index
    %35 = vector.load %arg8[%c0_21, %c0_22] : memref<32x4xf32, #tpu.memory_space<vmem>>, vector<32x4xf32>
    %cst_23 = arith.constant dense<0.000000e+00> : vector<32x128xf32>
    %36 = tpu.matmul %35, %8, %cst_23 {dimension_numbers = #tpu.dot_dimension_numbers<[1], [0], [0], [1], [0, 0, 1, 1], [], []>} : vector<32x4xf32>, vector<4x128xf32>, vector<32x128xf32> -> vector<32x128xf32>
    %37 = arith.addf %34, %36 : vector<32x128xf32>
    %38 = vector.broadcast %4 : vector<32x1xf32> to vector<32x128xf32>
    %39 = arith.addf %37, %38 : vector<32x128xf32>
    %cst_24 = arith.constant 0.000000e+00 : f32
    %40 = vector.broadcast %cst_24 : f32 to vector<32x128xf32>
    %41 = arith.maximumf %39, %40 : vector<32x128xf32>
    %c0_25 = arith.constant 0 : index
    %c0_26 = arith.constant 0 : index
    %42 = vector.load %arg9[%c0_25, %c0_26] : memref<64x32xf32, #tpu.memory_space<vmem>>, vector<64x32xf32>
    %cst_27 = arith.constant dense<0.000000e+00> : vector<64x128xf32>
    %43 = tpu.matmul %42, %41, %cst_27 {dimension_numbers = #tpu.dot_dimension_numbers<[1], [0], [0], [1], [0, 0, 1, 1], [], []>} : vector<64x32xf32>, vector<32x128xf32>, vector<64x128xf32> -> vector<64x128xf32>
    %44 = vector.broadcast %5 : vector<64x1xf32> to vector<64x128xf32>
    %45 = arith.addf %43, %44 : vector<64x128xf32>
    %cst_28 = arith.constant 0.000000e+00 : f32
    %46 = vector.broadcast %cst_28 : f32 to vector<64x128xf32>
    %47 = arith.maximumf %45, %46 : vector<64x128xf32>
    %c0_29 = arith.constant 0 : index
    %c0_30 = arith.constant 0 : index
    %48 = vector.load %arg10[%c0_29, %c0_30] : memref<32x64xf32, #tpu.memory_space<vmem>>, vector<32x64xf32>
    %cst_31 = arith.constant dense<0.000000e+00> : vector<32x128xf32>
    %49 = tpu.matmul %48, %47, %cst_31 {dimension_numbers = #tpu.dot_dimension_numbers<[1], [0], [0], [1], [0, 0, 1, 1], [], []>} : vector<32x64xf32>, vector<64x128xf32>, vector<32x128xf32> -> vector<32x128xf32>
    %50 = vector.broadcast %6 : vector<32x1xf32> to vector<32x128xf32>
    %51 = arith.addf %49, %50 : vector<32x128xf32>
    %52 = arith.negf %51 : vector<32x128xf32>
    %53 = math.exp %52 : vector<32x128xf32>
    %cst_32 = arith.constant 1.000000e+00 : f32
    %54 = vector.broadcast %cst_32 : f32 to vector<32x128xf32>
    %55 = arith.addf %54, %53 : vector<32x128xf32>
    %56 = arith.divf %54, %55 : vector<32x128xf32>
    %c0_33 = arith.constant 0 : index
    %c0_34 = arith.constant 0 : index
    %57 = vector.load %arg12[%c0_33, %c0_34] : memref<32x128xf32, #tpu.memory_space<vmem>>, vector<32x128xf32>
    tpu.vector_store %arg12[%c0_33, %c0_34], %56 {strides = array<i32>} : memref<32x128xf32, #tpu.memory_space<vmem>>, vector<32x128xf32>,
    %c0_35 = arith.constant 0 : index
    %c0_36 = arith.constant 0 : index
    %58 = vector.load %arg13[%c0_35, %c0_36] : memref<8x128xf32, #tpu.memory_space<vmem>>, vector<8x128xf32>
    tpu.vector_store %arg13[%c0_35, %c0_36], %26 {strides = array<i32>} : memref<8x128xf32, #tpu.memory_space<vmem>>, vector<8x128xf32>,
    %c0_37 = arith.constant 0 : index
    %c0_38 = arith.constant 0 : index
    %59 = vector.load %arg14[%c0_37, %c0_38] : memref<8x128xf32, #tpu.memory_space<vmem>>, vector<8x128xf32>
    tpu.vector_store %arg14[%c0_37, %c0_38], %27 {strides = array<i32>} : memref<8x128xf32, #tpu.memory_space<vmem>>, vector<8x128xf32>,
    return
  }
  func.func @transform_0(%arg0: i32) -> (i32, i32) {
    %c0_i32 = arith.constant 0 : i32
    %c0_i32_0 = arith.constant 0 : i32
    return %c0_i32, %arg0 : i32, i32
  }
  func.func @transform_1(%arg0: i32) -> (i32, i32) {
    %c0_i32 = arith.constant 0 : i32
    %c0_i32_0 = arith.constant 0 : i32
    return %c0_i32, %arg0 : i32, i32
  }
  func.func @transform_2(%arg0: i32) -> (i32, i32) {
    %c0_i32 = arith.constant 0 : i32
    %c0_i32_0 = arith.constant 0 : i32
    return %c0_i32, %arg0 : i32, i32
  }
  func.func @transform_3(%arg0: i32) -> (i32, i32) {
    %c0_i32 = arith.constant 0 : i32
    %c0_i32_0 = arith.constant 0 : i32
    %c0_i32_1 = arith.constant 0 : i32
    return %c0_i32, %c0_i32_0 : i32, i32
  }
  func.func @transform_4(%arg0: i32) -> (i32, i32) {
    %c0_i32 = arith.constant 0 : i32
    %c0_i32_0 = arith.constant 0 : i32
    %c0_i32_1 = arith.constant 0 : i32
    return %c0_i32, %c0_i32_0 : i32, i32
  }
  func.func @transform_5(%arg0: i32) -> (i32, i32) {
    %c0_i32 = arith.constant 0 : i32
    %c0_i32_0 = arith.constant 0 : i32
    %c0_i32_1 = arith.constant 0 : i32
    return %c0_i32, %c0_i32_0 : i32, i32
  }
  func.func @transform_6(%arg0: i32) -> (i32, i32) {
    %c0_i32 = arith.constant 0 : i32
    %c0_i32_0 = arith.constant 0 : i32
    %c0_i32_1 = arith.constant 0 : i32
    return %c0_i32, %c0_i32_0 : i32, i32
  }
  func.func @transform_7(%arg0: i32) -> (i32, i32) {
    %c0_i32 = arith.constant 0 : i32
    %c0_i32_0 = arith.constant 0 : i32
    %c0_i32_1 = arith.constant 0 : i32
    return %c0_i32, %c0_i32_0 : i32, i32
  }
  func.func @transform_8(%arg0: i32) -> (i32, i32) {
    %c0_i32 = arith.constant 0 : i32
    %c0_i32_0 = arith.constant 0 : i32
    %c0_i32_1 = arith.constant 0 : i32
    return %c0_i32, %c0_i32_0 : i32, i32
  }
  func.func @transform_9(%arg0: i32) -> (i32, i32) {
    %c0_i32 = arith.constant 0 : i32
    %c0_i32_0 = arith.constant 0 : i32
    %c0_i32_1 = arith.constant 0 : i32
    return %c0_i32, %c0_i32_0 : i32, i32
  }
  func.func @transform_10(%arg0: i32) -> (i32, i32) {
    %c0_i32 = arith.constant 0 : i32
    %c0_i32_0 = arith.constant 0 : i32
    %c0_i32_1 = arith.constant 0 : i32
    return %c0_i32, %c0_i32_0 : i32, i32
  }
  func.func @transform_11(%arg0: i32) -> (i32, i32) {
    %c0_i32 = arith.constant 0 : i32
    %c0_i32_0 = arith.constant 0 : i32
    return %c0_i32, %arg0 : i32, i32
  }
  func.func @transform_12(%arg0: i32) -> (i32, i32) {
    %c0_i32 = arith.constant 0 : i32
    %c0_i32_0 = arith.constant 0 : i32
    return %c0_i32, %arg0 : i32, i32
  }
  func.func @transform_13(%arg0: i32) -> (i32, i32) {
    %c0_i32 = arith.constant 0 : i32
    %c0_i32_0 = arith.constant 0 : i32
    return %c0_i32, %arg0 : i32, i32
  }
}

</mosaic_0001>

<bundles_post_ra>
// kernel: cvae_forward.1
= control target key start
LH: loop header
LB: loop body
LE: loop exit
PB: predicated region body
PF: predicated region fallthrough
CT: control target
= control target key end

     0   :  { %s2754_s0 = inlined_call_operand.vmem [shape: f32[36,256], index: 0, kind: input, shape index: {}]   ;;  %s2755_s1 = inlined_call_operand.vmem [shape: f32[4,256], index: 1, kind: input, shape index: {}]   ;;  %s2756_s2 = inlined_call_operand.vmem [shape: f32[8,256], index: 2, kind: input, shape index: {}]   ;;  %s2757_s3 = inlined_call_operand.vmem [shape: f32[64,36], index: 3, kind: input, shape index: {}]   ;;  %s2758_s4 = inlined_call_operand.vmem [shape: f32[32,64], index: 4, kind: input, shape index: {}]   ;;  %s2759_s5 = inlined_call_operand.vmem [shape: f32[16,32], index: 5, kind: input, shape index: {}]   ;;  %s2760_s6 = inlined_call_operand.vmem [shape: f32[32,8], index: 6, kind: input, shape index: {}]   ;;  %s2761_s7 = inlined_call_operand.vmem [shape: f32[32,4], index: 7, kind: input, shape index: {}]   ;;  %s2762_s8 = inlined_call_operand.vmem [shape: f32[64,32], index: 8, kind: input, shape index: {}]   ;;  %s2763_s9 = inlined_call_operand.vmem [shape: f32[32,64], index: 9, kind: input, shape index: {}]   ;;  %s2764_s10 = inlined_call_operand.vmem [shape: f32[240,1], index: 10, kind: input, shape index: {}]   ;;  %s2765_s11 = inlined_call_operand.hbm [shape: f32[32,256], index: 11, kind: output, shape index: {0}]   ;;  %s2766_s12 = inlined_call_operand.hbm [shape: f32[8,256], index: 12, kind: output, shape index: {1}]   ;;  %s2767_s13 = inlined_call_operand.hbm [shape: f32[8,256], index: 13, kind: output, shape index: {2}]  }
   0x1   :  { %2770 = sst [smem:[#allocation11_spill]] %s2754_s0 }
   0x2   :  { %2771 = sst [smem:[#allocation12_spill]] %s2755_s1 }
   0x3   :  { %2772 = sst [smem:[#allocation13_spill]] %s2756_s2 }
   0x4   :  { %2773 = sst [smem:[#allocation14_spill]] %s2757_s3 }
   0x5   :  { %2774 = sst [smem:[#allocation15_spill]] %s2758_s4 }
   0x6   :  { %19 = vsyncpa [#allocation4], 0 }
   0x7   :  { %21 = vsyncpa [#allocation4 + $0x1], 0 }
   0x8   :  { %22 = vsyncpa [#allocation6], 0 }
   0x9   :  { %24 = vsyncpa [#allocation6 + $0x1], 0  ;;  %s2338_s25 = smov 0   ;;  %s2340_s26 = smov 0  }
   0xa   :  { %s2342_s27 = smov 0   ;;  %s2344_s28 = smov 0  }
   0xb LB: > { %s2359_s29 = sadd.s32 4294967295, %s2259_s28   ;;  %s2768_s30 = sadd.s32 4294967294, %s2259_s28   ;;  %s2259_s28 = sphi %s2344_s28, %s2789_s28   ;;  %s2255_s27 = sphi %s2342_s27, %s2788_s27   ;;  %s2251_s26 = sphi %s2340_s26, %s2787_s26   ;;  %s2247_s25 = sphi %s2338_s25, %s2786_s25  }
   0xc   : > { %s2363_s14 = sadd.s32 1, %s2259_s28   ;;  %s37_s15 = sadd.s32 1, %s2255_s27 }
   0xd   : > { %s34_s16 = ssub.s32 %s2259_s28, %s2363_s14  ;;  %p44_p0 = scmp.ne.s32.totalorder %s2255_s27, %s2251_s26 }
   0xe   : > { %p35_p1 = scmp.eq.s32.totalorder %s34_s16, 0  ;;  %p45_p2 = scmp.eq.s32.totalorder %s2259_s28, 0 }
   0xf   : > { %p294_p3 = scmp.eq.s32.totalorder %s2359_s29, 1  ;;  %p299_p4 = scmp.ne.s32.totalorder %s2251_s26, %s2247_s25 }
  0x10   : > { %s2375_s17 = scalar_select %p35_p1, %s2255_s27, %s37_s15  }
  0x11   : > { %p46_p5 = por %p45_p2, %p44_p0  ;;  %p2377_p6 = por %p294_p3, %p44_p0 }
  0x12   : > { %2775 = sst [smem:[#allocation10_spill]] %s2375_s17  ;;  %p300_p7 = scmp.eq.s32.totalorder %s2768_s30, 1 }
  0x13   : > { %p2769_p9 = scmp.ge.s32.totalorder %s2259_s28, 2 }
  0x14   : > { %p2383_p8 = por %p300_p7, %p299_p4 }
  0x15   : > { %392 = sbr.rel (%p2769_p9) target bundleno = 41 (0x29), region = 48 }
  0x1c   : > { %395 = sbr.rel (!%p46_p5) target bundleno = 41 (0x29), region = 52  ;;  %s397_s20 = sand.u32 (%p46_p5), 1, %s2255_s27  }
  0x1d   : > { %s1769_s21 = sshll.u32 (%p46_p5), %s2259_s28, 3  ;;  %s2062_s22 = smul.u32 (%p46_p5), 40, %s397_s20 }
  0x1e   : > { %s2778_s0 = sld [smem:[#allocation11_spill]] (%p46_p5) }
  0x1f   : > { %s399_s16 = scalar_lea.vmem (%p46_p5), [#allocation2], %s2062_s22 }
  0x24   : > { %s401_s15 = scalar_lea.vmem %s2778_s0, %s1769_s21 }
  0x25   : > { %v437_v0 = vld [vmem:[%s401_s15] sm:$0xff]  ;;  %v439_v1 = vld [vmem:[%s401_s15 + $0x10] sm:$0xff] }
  0x26   : > { %v441_v2 = vld [vmem:[%s401_s15 + $0x20] sm:$0xff]  ;;  %v443_v3 = vld [vmem:[%s401_s15 + $0x30] sm:$0xff]  ;;  %438 = vst [vmem:[%s399_s16] sm:$0xff] %v437_v0  ;;  %440 = vst [vmem:[%s399_s16 + $0x8] sm:$0xff] %v439_v1 }
  0x27   : > { %v445_v4 = vld [vmem:[%s401_s15 + $0x40] sm:$0xff]  ;;  %442 = vst [vmem:[%s399_s16 + $0x10] sm:$0xff] %v441_v2  ;;  %444 = vst [vmem:[%s399_s16 + $0x18] sm:$0xff] %v443_v3 }
  0x28   : > { %446 = vst [vmem:[%s399_s16 + $0x20] sm:$0xff] %v445_v4 }
  0x29 PF: > { %p1770_p10 = scmp.ge.s32.totalorder %s2259_s28, 1  ;;  %p465_p11 = scmp.lt.s32.totalorder %s2259_s28, 3 }
  0x2b   : > { %p466_p12 = pnand %p1770_p10, %p465_p11 }
  0x2c   : > { %s2398_s20 = sand.u32 (!%p466_p12), 1, %s2251_s26   ;;  %s2779_s3 = sld [smem:[#allocation14_spill]] (!%p466_p12)  ;;  %vm626_vm0 = vcmask (!%p466_p12), 293888   ;;  %v2261_v6 = vmov (!%p466_p12), 0   ;;  %v541_v7 = vld [vmem:[%s2764_s10] sm:$0xff] (!%p466_p12)  ;;  %v543_v8 = vld [vmem:[%s2764_s10 + $0x10] sm:$0xff] (!%p466_p12) }
  0x2d   : > { %469 = sbr.rel (%p466_p12) target bundleno = 1482 (0x5ca), region = 98  ;;  %2117 = vset.pattern.permute.xlu0 (!%p466_p12), %v2261_v6  ;;  %2118 = vset.pattern.permute.xlu1 (!%p466_p12), %v2261_v6  ;;  %v542_v9 = vld [vmem:[%s2764_s10 + $0x8] sm:$0xff] (!%p466_p12)  ;;  %v544_v15 = vld [vmem:[%s2764_s10 + $0x18] sm:$0xff] (!%p466_p12)  ;;  %v545_v17 = vld [vmem:[%s2764_s10 + $0x20] sm:$0xff] (!%p466_p12)  ;;  %vm651_vm1 = vcmask (!%p466_p12), 1043456   ;;  %s2780_s4 = sld [smem:[#allocation15_spill]] (!%p466_p12) }
  0x2e   : > { %s2063_s22 = smul.u32 (!%p466_p12), 40, %s2398_s20  ;;  %588 = vperm.xlu0 (!%p466_p12), %2117, %v541_v7   ;;  %598 = vperm.xlu1 (!%p466_p12), %2118, %v543_v8   ;;  %v546_v18 = vld [vmem:[%s2764_s10 + $0x28] sm:$0xff] (!%p466_p12)  ;;  %v547_v20 = vld [vmem:[%s2764_s10 + $0x30] sm:$0xff] (!%p466_p12)  ;;  %v548_v21 = vld [vmem:[%s2764_s10 + $0x38] sm:$0xff] (!%p466_p12)  ;;  %vm792_vm2 = vcmask (!%p466_p12), 523264   ;;  %vm906_vm3 = vcmask (!%p466_p12), 261120  }
  0x2f   : > { %v549_v24 = vld [vmem:[%s2764_s10 + $0x40] sm:$0xff] (!%p466_p12)  ;;  %v550_v25 = vld [vmem:[%s2764_s10 + $0x48] sm:$0xff] (!%p466_p12)  ;;  %v551_v28 = vld [vmem:[%s2764_s10 + $0x50] sm:$0xff] (!%p466_p12)  ;;  %p533_p13 = scmp.lt.s32.totalorder (!%p466_p12), %s2359_s29, 1  ;;  %s2781_s1 = sld [smem:[#allocation12_spill]] (!%p466_p12)  ;;  %vm1001_vm4 = vcmask (!%p466_p12), 31744  }
  0x30   : > { %s474_s23 = scalar_lea.vmem (!%p466_p12), [#allocation2], %s2063_s22  ;;  %v552_v29 = vld [vmem:[%s2764_s10 + $0x58] sm:$0xff] (!%p466_p12)  ;;  %v554_v32 = vld [vmem:[%s2764_s10 + $0x68] sm:$0xff] (!%p466_p12)  ;;  %v553_v33 = vld [vmem:[%s2764_s10 + $0x60] sm:$0xff] (!%p466_p12)  ;;  %vm1102_vm5 = vcmask (!%p466_p12), 64512   ;;  %s2782_s2 = sld [smem:[#allocation13_spill]] (!%p466_p12) }
  0x31   : > { %v571_v10 = vld [vmem:[%s474_s23] sm:$0xff] (!%p466_p12)  ;;  %v572_v11 = vld [vmem:[%s474_s23 + $0x8] sm:$0xff] (!%p466_p12)  ;;  %v573_v12 = vld [vmem:[%s474_s23 + $0x10] sm:$0xff] (!%p466_p12) }
  0x32   : > { %v578_v5 = vld [vmem:[%s2779_s3] sm:$0xff] (!%p466_p12)  ;;  %v2002_v13 = vpack.c.bf16 (!%p466_p12), %v572_v11, %v571_v10  ;;  %593 = vperm.xlu0 (!%p466_p12), %2117, %v542_v9   ;;  %603 = vperm.xlu1 (!%p466_p12), %2118, %v544_v15   ;;  %v579_v22 = vld [vmem:[%s2779_s3 + $0x8] sm:$0xff] (!%p466_p12)  ;;  %v580_v23 = vld [vmem:[%s2779_s3 + $0x10] sm:$0xff] (!%p466_p12) }
  0x33   : > { %1899 = vmatprep.mubr.msk.f32.mxu0 (!%p466_p12), %vm626_vm0, %v578_v5  ;;  %v574_v14 = vld [vmem:[%s474_s23 + $0x18] sm:$0xff] (!%p466_p12)  ;;  %v575_v19 = vld [vmem:[%s474_s23 + $0x20] sm:$0xf] (!%p466_p12)  ;;  %v584_v31 = vld [vmem:[%s2779_s3 + $0x30] sm:$0xff] (!%p466_p12) }
  0x34   : > { %v2006_v16 = vpack.c.bf16 %v574_v14, %v573_v12  ;;  %2003 = vmatprep.subr.bf16.mxu0 %v2002_v13  ;;  %v581_v26 = vld [vmem:[%s2779_s3 + $0x18] sm:$0xff]  ;;  %v582_v27 = vld [vmem:[%s2779_s3 + $0x20] sm:$0xff]  ;;  %v583_v30 = vld [vmem:[%s2779_s3 + $0x28] sm:$0xff]  ;;  %s2551_s23 = scalar_select %p533_p13, %s2359_s29, 1 }
  0x35   : > { %2005 = vmatpush3.bf16.msra.mxu0 %v2002_v13  ;;  %v585_v34 = vld [vmem:[%s2779_s3 + $0x38] sm:$0xff]  ;;  %v555_v35 = vld [vmem:[%s2764_s10 + $0x70] sm:$0xff]  ;;  %v557_v37 = vld [vmem:[%s2764_s10 + $0x80] sm:$0xff]  ;;  %s1772_s3 = sshll.u32 %s2398_s20, 3 }
  0x36   : > { %2007 = vmatprep.subr.bf16.mxu0 %v2006_v16  ;;  %608 = vperm.xlu0 %2117, %v545_v17   ;;  %v556_v36 = vld [vmem:[%s2764_s10 + $0x78] sm:$0xff]  ;;  %v558_v38 = vld [vmem:[%s2764_s10 + $0x88] sm:$0xff]  ;;  %v559_v39 = vld [vmem:[%s2764_s10 + $0x90] sm:$0xff]  ;;  %s1774_s22 = sshll.u32 %s2551_s23, 2  ;;  %s2576_s30 = scalar_lea.vmem [#allocation7], %s1772_s3 }
  0x37   : > { %613 = vperm.xlu1 %2118, %v546_v18   ;;  %v560_v40 = vld [vmem:[%s2764_s10 + $0x98] sm:$0xff]  ;;  %v561_v41 = vld [vmem:[%s2764_s10 + $0xa0] sm:$0xff]  ;;  %v562_v42 = vld [vmem:[%s2764_s10 + $0xa8] sm:$0xff]  ;;  %s536_s21 = scalar_lea.vmem %s2781_s1, %s1774_s22  ;;  %s2579_s15 = scalar_lea.vmem [#allocation5], %s1772_s3 }
  0x38   : > { %v563_v43 = vld [vmem:[%s2764_s10 + $0xb0] sm:$0xff]  ;;  %v564_v44 = vld [vmem:[%s2764_s10 + $0xb8] sm:$0xff]  ;;  %v565_v45 = vld [vmem:[%s2764_s10 + $0xc0] sm:$0xff]  ;;  %s1775_s0 = sshll.u32 %s2551_s23, 3  ;;  %s1616_s3 = sshll.u32 %s2576_s30, 4  ;;  %s2658_s3 = int_to_ptr.vmem [resolvable:$true] %s1616_s3 }
  0x39   : > { %2009 = vmatpush3.bf16.msra.mxu0 %v2006_v16  ;;  %v566_v46 = vld [vmem:[%s2764_s10 + $0xc8] sm:$0xff]  ;;  %v567_v47 = vld [vmem:[%s2764_s10 + $0xd0] sm:$0xff]  ;;  %v568_v48 = vld [vmem:[%s2764_s10 + $0xd8] sm:$0xff]  ;;  %s540_s16 = scalar_lea.vmem %s2782_s2, %s1775_s0  ;;  %s1569_s23 = sand.u32 1, %s2359_s29  }
  0x3a   : > { %1897 = vmatprep.subr.msk.mxu0 %vm651_vm1, %v575_v19  ;;  %618 = vperm.xlu0 %2117, %v547_v20   ;;  %v569_v49 = vld [vmem:[%s2764_s10 + $0xe0] sm:$0xff]  ;;  %v570_v50 = vld [vmem:[%s2764_s10 + $0xe8] sm:$0xff]  ;;  %s2649_s0 = sshll.u32 %s2359_s29, 7  ;;  %s2660_s2 = scalar_lea.sflag [#allocation6], %s1569_s23 }
  0x3b   : > { %623 = vperm.xlu1 %2118, %v548_v21   ;;  %v768_v51 = vld [vmem:[%s2780_s4] sm:$0xff]  ;;  %s2655_s1 = scalar_lea.hbm %s2766_s12, %s2649_s0 }
  0x3c   : > { %1927 = vmatprep.mubr.msk.f32.mxu1 %vm792_vm2, %v768_v51  ;;  %v1000_v51 = vld [vmem:[%s2761_s7 + $0x18] sm:$0xff] }
  0x3d   : > { %1898 = vmatpush3.msk.msra.mxu0 %vm651_vm1, %v575_v19 }
  0x3e   : > { %1900 = vmatmul.mubr.msk.f32.vlgmr.msra.gmra.mrb[0].mxu0 %vm626_vm0, %v579_v22  ;;  %774 = vperm.xlu0 %2117, %v549_v24   ;;  %v769_v24 = vld [vmem:[%s2780_s4 + $0x8] sm:$0xff] }
  0x3f   : > { %1902 = vmatprep.mubr.msk.f32.mxu0 %vm626_vm0, %v580_v23  ;;  %779 = vperm.xlu1 %2118, %v550_v25   ;;  %v770_v25 = vld [vmem:[%s2780_s4 + $0x10] sm:$0xff] }
  0x42   : > { %1903 = vmatmul.mubr.msk.f32.gmra.mrb[2].mxu0 %vm626_vm0, %v581_v26  ;;  %784 = vperm.xlu0 %2117, %v551_v28   ;;  %v771_v26 = vld [vmem:[%s2780_s4 + $0x18] sm:$0xff] }
  0x43   : > { %1905 = vmatprep.mubr.msk.f32.mxu0 %vm626_vm0, %v582_v27  ;;  %789 = vperm.xlu1 %2118, %v552_v29   ;;  %v894_v27 = vld [vmem:[%s2759_s5] sm:$0xff] }
  0x46   : > { %1906 = vmatmul.mubr.msk.f32.gmra.mrb[4].mxu0 %vm626_vm0, %v583_v30  ;;  %903 = vperm.xlu0 %2117, %v554_v32  }
  0x47   : > { %1908 = vmatprep.mubr.msk.f32.mxu0 %vm626_vm0, %v584_v31  ;;  %898 = vperm.xlu1 %2118, %v553_v33  }
  0x4a   : > { %1909 = vmatmul.mubr.msk.f32.gmra.mrb[6].mxu0 %vm626_vm0, %v585_v34  ;;  %1202 = vperm.xlu0 %2117, %v555_v35  }
  0x4b   : > { %1207 = vperm.xlu1 %2118, %v556_v36   ;;  %1941 = vmatprep.mubr.msk.f32.mxu0 %vm906_vm3, %v894_v27  ;;  %v1233_v27 = vld [vmem:[%s2762_s8 + $0x28] sm:$0xff] }
  0x4e   : > { %1212 = vperm.xlu0 %2117, %v557_v37  }
  0x4f   : > { %1217 = vperm.xlu1 %2118, %v558_v38  }
  0x52   : > { %1238 = vperm.xlu0 %2117, %v559_v39  }
  0x53   : > { %1243 = vperm.xlu1 %2118, %v560_v40  }
  0x56   : > { %1248 = vperm.xlu0 %2117, %v561_v41  }
  0x57   : > { %1253 = vperm.xlu1 %2118, %v562_v42  }
  0x5a   : > { %1258 = vperm.xlu0 %2117, %v563_v43  }
  0x5b   : > { %1263 = vperm.xlu1 %2118, %v564_v44  }
  0x5e   : > { %1268 = vperm.xlu0 %2117, %v565_v45  }
  0x5f   : > { %1273 = vperm.xlu1 %2118, %v566_v46   ;;  %v895_v46 = vld [vmem:[%s2759_s5 + $0x8] sm:$0xff] }
  0x62   : > { %1419 = vperm.xlu0 %2117, %v567_v47   ;;  %v576_v47 = vld [vmem:[%s536_s21] sm:$0xf] }
  0x63   : > { %1424 = vperm.xlu1 %2118, %v568_v48   ;;  %v997_v48 = vld [vmem:[%s2761_s7] sm:$0xff] }
  0x66   : > { %1429 = vperm.xlu0 %2117, %v569_v49   ;;  %v998_v49 = vld [vmem:[%s2761_s7 + $0x8] sm:$0xff] }
  0x67   : > { %1434 = vperm.xlu1 %2118, %v570_v50   ;;  %v999_v50 = vld [vmem:[%s2761_s7 + $0x10] sm:$0xff] }
  0xad   : > { %v589_v52 = vpop.permute.xlu0 %588  ;;  %v599_v53 = vpop.permute.xlu1 %598 }
  0xb1   : > { %v594_v54 = vpop.permute.xlu0 %593  ;;  %v604_v55 = vpop.permute.xlu1 %603 }
  0xb5   : > { %v609_v4 = vpop.permute.xlu0 %608 }
  0xb6   : > { %v614_v1 = vpop.permute.xlu1 %613 }
  0xb9   : > { %v619_v16 = vpop.permute.xlu0 %618 }
  0xba   : > { %v624_v13 = vpop.permute.xlu1 %623 }
  0xbd   : > { %v775_v29 = vpop.permute.xlu0 %774 }
  0xbe   : > { %v780_v28 = vpop.permute.xlu1 %779 }
  0xc1   : > { %v785_v38 = vpop.permute.xlu0 %784 }
  0xc2   : > { %v790_v35 = vpop.permute.xlu1 %789 }
 0x111   : > { %v1901_v56 = vpop.f32.mrb[0].mxu0 }
 0x112   : > { %v727_v57 = vadd.f32 %v1901_v56, %v594_v54  ;;  %v721_v58 = vpop.f32.mrb[1].mxu0 }
 0x113   : > { %v722_v59 = vadd.f32 %v721_v58, %v589_v52  ;;  %v993_v52 = vld [vmem:[%s2760_s6] sm:$0xff] }
 0x114   : > { %v761_v60 = vmax.f32 %v727_v57, 0.0 }
 0x115   : > { %v760_v61 = vmax.f32 %v722_v59, 0.0  ;;  %v1904_v62 = vpop.f32.mrb[2].mxu0 }
 0x116   : > { %v737_v63 = vadd.f32 %v1904_v62, %v604_v55  ;;  %v731_v0 = vpop.f32.mrb[3].mxu0  ;;  %v899_v55 = vpop.permute.xlu1 %898 }
 0x117   : > { %v732_v2 = vadd.f32 %v731_v0, %v599_v53  ;;  %v2010_v3 = vpack.c.bf16 %v761_v60, %v760_v61  ;;  %v904_v53 = vpop.permute.xlu0 %903  ;;  %v577_v61 = vld [vmem:[%s540_s16] sm:$0xff]  ;;  %s1603_s16 = sshll.u32 %s2579_s15, 4  ;;  %s1604_s16 = int_to_ptr.vmem [resolvable:$true] %s1603_s16 }
 0x118   : > { %v763_v5 = vmax.f32 %v737_v63, 0.0  ;;  %s2137_s21 = scalar_lea.vmem %s1604_s16, 128 }
 0x119   : > { %v762_v6 = vmax.f32 %v732_v2, 0.0  ;;  %v1907_v7 = vpop.f32.mrb[4].mxu0  ;;  %2011 = vmatprep.subr.bf16.mxu1 %v2010_v3  ;;  %v995_v2 = vld [vmem:[%s2760_s6 + $0x10] sm:$0xff]  ;;  %p2138_p0 = scmp.ne.s32.totalorder %s1604_s16, %s2137_s21 }
 0x11a   : > { %v747_v8 = vadd.f32 %v1907_v7, %v614_v1  ;;  %v741_v9 = vpop.f32.mrb[5].mxu0  ;;  %2013 = vmatpush3.bf16.msra.mxu1 %v2010_v3  ;;  %v994_v1 = vld [vmem:[%s2760_s6 + $0x8] sm:$0xff]  ;;  %v996_v3 = vld [vmem:[%s2760_s6 + $0x18] sm:$0xff] }
 0x11b   : > { %v2014_v10 = vpack.c.bf16 %v763_v5, %v762_v6  ;;  %v742_v11 = vadd.f32 %v741_v9, %v609_v4  ;;  %v1228_v4 = vld [vmem:[%s2762_s8] sm:$0xff]  ;;  %v1208_v5 = vpop.permute.xlu1 %1207  ;;  %v1203_v6 = vpop.permute.xlu0 %1202  ;;  %p2139_p1 = pnand %p2138_p0, %p2377_p6 }
 0x11c   : > { %v765_v12 = vmax.f32 %v747_v8, 0.0 }
 0x11d   : > { %v764_v14 = vmax.f32 %v742_v11, 0.0  ;;  %v1910_v15 = vpop.f32.mrb[6].mxu0  ;;  %2015 = vmatprep.subr.bf16.mxu1 %v2014_v10  ;;  %p2140_p2 = pneg %p2139_p1 }
 0x11e   : > { %v757_v17 = vadd.f32 %v1910_v15, %v624_v13  ;;  %v751_v18 = vpop.f32.mrb[7].mxu0  ;;  %2017 = vmatpush3.bf16.msra.mxu1 %v2014_v10 }
 0x11f   : > { %v2018_v19 = vpack.c.bf16 %v765_v12, %v764_v14  ;;  %v752_v20 = vadd.f32 %v751_v18, %v619_v16  ;;  %v1218_v12 = vpop.permute.xlu1 %1217  ;;  %v1213_v15 = vpop.permute.xlu0 %1212 }
 0x120   : > { %v767_v21 = vmax.f32 %v757_v17, 0.0 }
 0x121   : > { %v766_v22 = vmax.f32 %v752_v20, 0.0  ;;  %2019 = vmatprep.subr.bf16.mxu1 %v2018_v19 }
 0x122   : > { %2021 = vmatpush3.bf16.msra.mxu1 %v2018_v19 }
 0x123   : > { %v2022_v23 = vpack.c.bf16 %v767_v21, %v766_v22 }
 0x125   : > { %2023 = vmatprep.subr.bf16.mxu1 %v2022_v23 }
 0x126   : > { %2025 = vmatpush3.bf16.msra.mxu1 %v2022_v23  ;;  %v1229_v23 = vld [vmem:[%s2762_s8 + $0x8] sm:$0xff] }
 0x129   : > { %1928 = vmatmul.mubr.msk.f32.vlgmr.msra.gmra.mrb[0].mxu1 %vm792_vm2, %v769_v24  ;;  %v1230_v24 = vld [vmem:[%s2762_s8 + $0x10] sm:$0xff] }
 0x12a   : > { %1930 = vmatprep.mubr.msk.f32.mxu1 %vm792_vm2, %v770_v25  ;;  %v1231_v25 = vld [vmem:[%s2762_s8 + $0x18] sm:$0xff] }
 0x12d   : > { %1931 = vmatmul.mubr.msk.f32.gmra.mrb[2].mxu1 %vm792_vm2, %v771_v26  ;;  %v1232_v26 = vld [vmem:[%s2762_s8 + $0x20] sm:$0xff] }
 0x12e   : > { %1968 = vmatprep.mubr.msk.f32.mxu1 %vm906_vm3, %v1228_v4  ;;  %v1415_v4 = vld [vmem:[%s2763_s9 + $0x10] sm:$0xff] }
 0x1fc   : > { %v1929_v30 = vpop.f32.mrb[0].mxu1 }
 0x1fd   : > { %v877_v31 = vadd.f32 %v1929_v30, %v780_v28  ;;  %v871_v32 = vpop.f32.mrb[1].mxu1  ;;  %v1234_v28 = vld [vmem:[%s2762_s8 + $0x30] sm:$0xff]  ;;  %v1413_v30 = vld [vmem:[%s2763_s9] sm:$0xff] }
 0x1fe   : > { %v872_v33 = vadd.f32 %v871_v32, %v775_v29  ;;  %v1235_v29 = vld [vmem:[%s2762_s8 + $0x38] sm:$0xff]  ;;  %v1239_v32 = vpop.permute.xlu0 %1238 }
 0x1ff   : > { %v891_v34 = vmax.f32 %v877_v31, 0.0  ;;  %v1244_v31 = vpop.permute.xlu1 %1243 }
 0x200   : > { %v890_v36 = vmax.f32 %v872_v33, 0.0  ;;  %v1932_v37 = vpop.f32.mrb[2].mxu1 }
 0x201   : > { %v887_v39 = vadd.f32 %v1932_v37, %v790_v35  ;;  %v881_v40 = vpop.f32.mrb[3].mxu1 }
 0x202   : > { %v2026_v41 = vpack.c.bf16 %v891_v34, %v890_v36  ;;  %v882_v42 = vadd.f32 %v881_v40, %v785_v38  ;;  %v1249_v35 = vpop.permute.xlu0 %1248 }
 0x203   : > { %v893_v43 = vmax.f32 %v887_v39, 0.0  ;;  %v1254_v33 = vpop.permute.xlu1 %1253 }
 0x204   : > { %v892_v44 = vmax.f32 %v882_v42, 0.0  ;;  %2027 = vmatprep.subr.bf16.mxu0 %v2026_v41 }
 0x205   : > { %2029 = vmatpush3.bf16.msra.mxu0 %v2026_v41 }
 0x206   : > { %v2030_v45 = vpack.c.bf16 %v893_v43, %v892_v44 }
 0x207   : > { %v1264_v44 = vpop.permute.xlu1 %1263 }
 0x208   : > { %2031 = vmatprep.subr.bf16.mxu0 %v2030_v45 }
 0x209   : > { %2033 = vmatpush3.bf16.msra.mxu0 %v2030_v45 }
 0x20a   : > { %1944 = vmatprep.subr.msk.mxu0 %vm651_vm1, %v576_v47 }
 0x20c   : > { %1942 = vmatmul.mubr.msk.f32.vlgmr.msra.gmra.mrb[8].mxu0 %vm906_vm3, %v895_v46 }
 0x20d   : > { %1945 = vmatpush3.msk.msra.mxu0 %vm651_vm1, %v576_v47  ;;  %1946 = vmatprep.mubr.msk.f32.mxu0 %vm1001_vm4, %v997_v48  ;;  %v1259_v47 = vpop.permute.xlu0 %1258 }
 0x210   : > { %1947 = vmatmul.mubr.msk.f32.vlgmr.msra.gmra.mrb[10].mxu0 %vm1001_vm4, %v998_v49 }
 0x211   : > { %1949 = vmatprep.mubr.msk.f32.mxu0 %vm1001_vm4, %v999_v50 }
 0x214   : > { %1950 = vmatmul.mubr.msk.f32.gmra.mrb[12].mxu0 %vm1001_vm4, %v1000_v51 }
 0x215   : > { %1954 = vmatprep.mubr.msk.f32.mxu0 %vm1102_vm5, %v993_v52 }
 0x2df   : > { %v1943_v54 = vpop.f32.mrb[8].mxu0 }
 0x2e0   : > { %v985_v56 = vadd.f32 %v1943_v54, %v904_v53  ;;  %v979_v57 = vpop.f32.mrb[9].mxu0 }
 0x2e1   : > { %v980_v58 = vadd.f32 %v979_v57, %v899_v55 }
 0x2e2   : > { %v988_v59 = vmul.f32 0.5, %v985_v56  ;;  %1563 = vst [vmem:[%s2576_s30] sm:$0xff] %v985_v56  ;;  %v1274_v56 = vpop.permute.xlu1 %1273  ;;  %s2262_s30 = smov [#allocation5]  }
 0x2e3   : > { %1562 = vst [vmem:[%s2579_s15] sm:$0xff] %v980_v58  ;;  %s2141_s29 = sshll.u32 %s2262_s30, 4  ;;  %s2142_s29 = int_to_ptr.vmem [resolvable:$false] %s2141_s29 }
 0x2e4   : > { %v989_v60 = vmul.f32 1.442695, %v988_v59  ;;  %v1269_v59 = vpop.permute.xlu0 %1268  ;;  %s2143_s24 = scalar_lea.vmem %s2142_s29, 256  ;;  %p2144_p3 = scmp.lt.s32.totalorder %s1604_s16, %s2142_s29 }
 0x2e5   : > { %p2145_p4 = scmp.lt.s32.totalorder %s2143_s24, %s2137_s21 }
 0x2e6   : > { %2119 = vpow2.f32 %v989_v60 }
 0x2e7   : > { %p2146_p5 = por %p2145_p4, %p2144_p3 }
 0x2e9   : > { %p2147_p7 = pnand %p2146_p5, %p2140_p2 }
 0x2f0   : > { %v2120_v62 = vpop.eup %2119 }
 0x2f1   : > { %v991_v63 = vmul.f32 %v2120_v62, %v577_v61 }
 0x2f3   : > { %v992_v0 = vadd.f32 %v991_v63, %v980_v58 }
 0x2f5   : > { %1952 = vmatprep.subr.mxu0 %v992_v0 }
 0x2f6   : > { %1953 = vmatpush3.msra.mxu0 %v992_v0 }
 0x2f7   : > { %1955 = vmatmul.mubr.msk.f32.vlgmr.msra.gmra.mrb[10].mxu0 %vm1102_vm5, %v994_v1 }
 0x2f8   : > { %1957 = vmatprep.mubr.msk.f32.mxu0 %vm1102_vm5, %v995_v2 }
 0x2fb   : > { %1958 = vmatmul.mubr.msk.f32.gmra.mrb[12].mxu0 %vm1102_vm5, %v996_v3  ;;  %v1414_v3 = vld [vmem:[%s2763_s9 + $0x8] sm:$0xff] }
 0x3ca   : > { %v1956_v7 = vpop.f32.mrb[10].mxu0 }
 0x3cb   : > { %v1221_v8 = vadd.f32 %v1956_v7, %v1208_v5  ;;  %v1181_v9 = vpop.f32.mrb[11].mxu0  ;;  %v1416_v5 = vld [vmem:[%s2763_s9 + $0x18] sm:$0xff] }
 0x3cc   : > { %v1220_v10 = vadd.f32 %v1203_v6, %v1181_v9 }
 0x3cd   : > { %v1225_v11 = vmax.f32 %v1221_v8, 0.0 }
 0x3ce   : > { %v1224_v13 = vmax.f32 %v1220_v10, 0.0  ;;  %v1959_v14 = vpop.f32.mrb[12].mxu0 }
 0x3cf   : > { %v1223_v16 = vadd.f32 %v1959_v14, %v1218_v12  ;;  %v1191_v17 = vpop.f32.mrb[13].mxu0 }
 0x3d0   : > { %v2034_v18 = vpack.c.bf16 %v1225_v11, %v1224_v13  ;;  %v1222_v19 = vadd.f32 %v1213_v15, %v1191_v17 }
 0x3d1   : > { %v1227_v20 = vmax.f32 %v1223_v16, 0.0 }
 0x3d2   : > { %v1226_v21 = vmax.f32 %v1222_v19, 0.0  ;;  %2035 = vmatprep.subr.bf16.mxu1 %v2034_v18 }
 0x3d3   : > { %2037 = vmatpush3.bf16.msra.mxu1 %v2034_v18 }
 0x3d4   : > { %v2038_v22 = vpack.c.bf16 %v1227_v20, %v1226_v21 }
 0x3d6   : > { %2039 = vmatprep.subr.bf16.mxu1 %v2038_v22 }
 0x3d7   : > { %2041 = vmatpush3.bf16.msra.mxu1 %v2038_v22 }
 0x3da   : > { %1969 = vmatmul.mubr.msk.f32.vlgmr.msra.gmra.mrb[4].mxu1 %vm906_vm3, %v1229_v23 }
 0x3db   : > { %1971 = vmatprep.mubr.msk.f32.mxu1 %vm906_vm3, %v1230_v24 }
 0x3de   : > { %1972 = vmatmul.mubr.msk.f32.gmra.mrb[6].mxu1 %vm906_vm3, %v1231_v25 }
 0x3df   : > { %1974 = vmatprep.mubr.msk.f32.mxu1 %vm906_vm3, %v1232_v26 }
 0x3e2   : > { %1975 = vmatmul.mubr.msk.f32.gmra.mrb[8].mxu1 %vm906_vm3, %v1233_v27 }
 0x3e3   : > { %1977 = vmatprep.mubr.msk.f32.mxu1 %vm906_vm3, %v1234_v28 }
 0x3e6   : > { %1978 = vmatmul.mubr.msk.f32.gmra.mrb[10].mxu1 %vm906_vm3, %v1235_v29 }
 0x3e7   : > { %1996 = vmatprep.mubr.msk.f32.mxu1 %vm792_vm2, %v1413_v30 }
 0x4ad   : > { %v1970_v34 = vpop.f32.mrb[4].mxu1 }
 0x4ae   : > { %v1372_v36 = vadd.f32 %v1970_v34, %v1244_v31  ;;  %v1366_v37 = vpop.f32.mrb[5].mxu1 }
 0x4af   : > { %v1367_v38 = vadd.f32 %v1366_v37, %v1239_v32 }
 0x4b0   : > { %v1406_v39 = vmax.f32 %v1372_v36, 0.0 }
 0x4b1   : > { %v1405_v40 = vmax.f32 %v1367_v38, 0.0  ;;  %v1973_v41 = vpop.f32.mrb[6].mxu1 }
 0x4b2   : > { %v1382_v42 = vadd.f32 %v1973_v41, %v1254_v33  ;;  %v1376_v43 = vpop.f32.mrb[7].mxu1 }
 0x4b3   : > { %v2042_v45 = vpack.c.bf16 %v1406_v39, %v1405_v40  ;;  %v1377_v46 = vadd.f32 %v1376_v43, %v1249_v35 }
 0x4b4   : > { %v1408_v48 = vmax.f32 %v1382_v42, 0.0 }
 0x4b5   : > { %v1407_v49 = vmax.f32 %v1377_v46, 0.0  ;;  %v1976_v50 = vpop.f32.mrb[8].mxu1  ;;  %2043 = vmatprep.subr.bf16.mxu1 %v2042_v45 }
 0x4b6   : > { %v1392_v51 = vadd.f32 %v1976_v50, %v1264_v44  ;;  %v1386_v52 = vpop.f32.mrb[9].mxu1  ;;  %2045 = vmatpush3.bf16.msra.mxu1 %v2042_v45 }
 0x4b7   : > { %v2046_v53 = vpack.c.bf16 %v1408_v48, %v1407_v49  ;;  %v1387_v54 = vadd.f32 %v1386_v52, %v1259_v47 }
 0x4b8   : > { %v1410_v55 = vmax.f32 %v1392_v51, 0.0 }
 0x4b9   : > { %v1409_v57 = vmax.f32 %v1387_v54, 0.0  ;;  %v1979_v58 = vpop.f32.mrb[10].mxu1  ;;  %2047 = vmatprep.subr.bf16.mxu1 %v2046_v53 }
 0x4ba   : > { %v1402_v60 = vadd.f32 %v1979_v58, %v1274_v56  ;;  %v1396_v61 = vpop.f32.mrb[11].mxu1  ;;  %2049 = vmatpush3.bf16.msra.mxu1 %v2046_v53 }
 0x4bb   : > { %v2050_v62 = vpack.c.bf16 %v1410_v55, %v1409_v57  ;;  %v1397_v63 = vadd.f32 %v1396_v61, %v1269_v59 }
 0x4bc   : > { %v1412_v0 = vmax.f32 %v1402_v60, 0.0 }
 0x4bd   : > { %v1411_v1 = vmax.f32 %v1397_v63, 0.0  ;;  %2051 = vmatprep.subr.bf16.mxu1 %v2050_v62 }
 0x4be   : > { %2053 = vmatpush3.bf16.msra.mxu1 %v2050_v62 }
 0x4bf   : > { %v2054_v2 = vpack.c.bf16 %v1412_v0, %v1411_v1 }
 0x4c1   : > { %2055 = vmatprep.subr.bf16.mxu1 %v2054_v2 }
 0x4c2   : > { %2057 = vmatpush3.bf16.msra.mxu1 %v2054_v2 }
 0x4c5   : > { %1997 = vmatmul.mubr.msk.f32.vlgmr.msra.gmra.mrb[12].mxu1 %vm792_vm2, %v1414_v3 }
 0x4c6   : > { %1999 = vmatprep.mubr.msk.f32.mxu1 %vm792_vm2, %v1415_v4 }
 0x4c9   : > { %2000 = vmatmul.mubr.msk.f32.gmra.mrb[14].mxu1 %vm792_vm2, %v1416_v5 }
 0x4ca   : > { %2150 = shalt.err (!%p2147_p7)
}
 0x4cb   : > { %s2151_s15 = scalar_lea.hbm %s2655_s1, 128  ;;  %s2155_s22 = scalar_lea.hbm %s2766_s12, 256 }
 0x4cc   : > { %p2152_p10 = scmp.ne.s32.totalorder %s2655_s1, %s2151_s15  ;;  %p2156_p13 = scmp.lt.u32.totalorder %s2655_s1, %s2766_s12 }
 0x4cd   : > { %p2157_p0 = scmp.lt.u32.totalorder %s2155_s22, %s2151_s15  ;;  %p2159_p2 = scmp.lt.u32.totalorder %s2151_s15, %s2655_s1 }
 0x4ce   : > { %p2153_p11 = pnand %p2152_p10, %p2377_p6 }
 0x4cf   : > { %p2158_p1 = por %p2157_p0, %p2156_p13 }
 0x4d0   : > { %p2154_p12 = pneg %p2153_p11 }
 0x4d1   : > { %p2160_p3 = por %p2159_p2, %p2158_p1 }
 0x4d3   : > { %p2161_p4 = pnand %p2160_p3, %p2154_p12 }
 0x4d5   : > { %2164 = shalt.err (!%p2161_p4)
}
 0x4d6   : > { %2065 = dma.vmem_to_hbm [thread:$0]  (%p2377_p6), %s1604_s16, 128, %s2655_s1, %s2660_s2  }
 0x4d7   : > { %s1614_s23 = scalar_lea.hbm %s2767_s13, %s2649_s0  ;;  %s2165_s17 = scalar_lea.vmem %s2658_s3, 128 }
 0x4d8   : > { %p2166_p5 = scmp.ne.s32.totalorder %s2658_s3, %s2165_s17  ;;  %s2263_s15 = smov [#allocation7]  }
 0x4d9   : > { %s2169_s22 = sshll.u32 %s2263_s15, 4  ;;  %s2170_s22 = int_to_ptr.vmem [resolvable:$false] %s2169_s22 }
 0x4da   : > { %p2167_p7 = pnand %p2166_p5, %p2377_p6  ;;  %s2171_s30 = scalar_lea.vmem %s2170_s22, 256 }
 0x4db   : > { %p2172_p11 = scmp.lt.s32.totalorder %s2658_s3, %s2170_s22  ;;  %p2173_p12 = scmp.lt.s32.totalorder %s2171_s30, %s2165_s17 }
 0x4dc   : > { %p2168_p10 = pneg %p2167_p7 }
 0x4dd   : > { %p2174_p13 = por %p2173_p12, %p2172_p11 }
 0x4df   : > { %p2175_p0 = pnand %p2174_p13, %p2168_p10 }
 0x4e1   : > { %2178 = shalt.err (!%p2175_p0)
}
 0x4e2   : > { %s2179_s29 = scalar_lea.hbm %s1614_s23, 128  ;;  %s2183_s21 = scalar_lea.hbm %s2767_s13, 256 }
 0x4e3   : > { %p2180_p1 = scmp.ne.s32.totalorder %s1614_s23, %s2179_s29  ;;  %p2184_p4 = scmp.lt.u32.totalorder %s1614_s23, %s2767_s13 }
 0x4e4   : > { %p2185_p5 = scmp.lt.u32.totalorder %s2183_s21, %s2179_s29  ;;  %p2187_p9 = scmp.lt.u32.totalorder %s2179_s29, %s1614_s23 }
 0x4e5   : > { %p2181_p2 = pnand %p2180_p1, %p2377_p6 }
 0x4e6   : > { %p2186_p7 = por %p2185_p5, %p2184_p4 }
 0x4e7   : > { %p2182_p3 = pneg %p2181_p2 }
 0x4e8   : > { %p2188_p11 = por %p2187_p9, %p2186_p7 }
 0x4ea   : > { %p2189_p10 = pnand %p2188_p11, %p2182_p3 }
 0x4ec   : > { %2192 = shalt.err (!%p2189_p10)
}
 0x4ed   : > { %2066 = dma.vmem_to_hbm [thread:$0]  (%p2377_p6), %s2658_s3, 128, %s1614_s23, %s2660_s2   ;;  %v1425_v6 = vpop.permute.xlu1 %1424  ;;  %v1420_v7 = vpop.permute.xlu0 %1419 }
 0x4ee   : > { %s1771_s2 = sshll.u32 %s2398_s20, 5  ;;  %s2708_s15 = scalar_lea.hbm %s2765_s11, %s2649_s0 }
 0x4ef   : > { %s518_s4 = scalar_lea.vmem [#allocation3], %s1771_s2  ;;  %s1565_s22 = scalar_lea.sflag [#allocation4], %s2398_s20 }
 0x4f0   : > { %s1587_s3 = sshll.u32 %s518_s4, 4  ;;  %s2264_s29 = smov [#allocation3]   ;;  %s2702_s3 = int_to_ptr.vmem [resolvable:$true] %s1587_s3 }
 0x4f1   : > { %v1435_v13 = vpop.permute.xlu1 %1434  ;;  %v1430_v16 = vpop.permute.xlu0 %1429  ;;  %s2193_s30 = scalar_lea.vmem %s2702_s3, 512  ;;  %s2197_s1 = sshll.u32 %s2264_s29, 4  ;;  %s2198_s1 = int_to_ptr.vmem [resolvable:$false] %s2197_s1 }
 0x4f2   : > { %p2194_p9 = scmp.ne.s32.totalorder %s2702_s3, %s2193_s30  ;;  %s2199_s16 = scalar_lea.vmem %s2198_s1, 1024 }
 0x4f3   : > { %p2200_p0 = scmp.lt.s32.totalorder %s2702_s3, %s2198_s1  ;;  %p2201_p1 = scmp.lt.s32.totalorder %s2199_s16, %s2193_s30 }
 0x4f4   : > { %p2195_p12 = pnand %p2194_p9, %p2377_p6 }
 0x4f5   : > { %p2202_p2 = por %p2201_p1, %p2200_p0 }
 0x4f6   : > { %p2196_p13 = pneg %p2195_p12 }
 0x4f8   : > { %p2203_p3 = pnand %p2202_p2, %p2196_p13 }
 0x598   : > { %v1998_v8 = vpop.f32.mrb[12].mxu1 }
 0x599   : > { %v1521_v9 = vadd.f32 %v1998_v8, %v1425_v6  ;;  %v1515_v10 = vpop.f32.mrb[13].mxu1 }
 0x59a   : > { %v1516_v11 = vadd.f32 %v1515_v10, %v1420_v7 }
 0x59b   : > { %v1813_v12 = vmul.f32 -1.442695, %v1521_v9 }
 0x59c   : > { %v1812_v14 = vmul.f32 -1.442695, %v1516_v11  ;;  %v2001_v15 = vpop.f32.mrb[14].mxu1 }
 0x59d   : > { %2121 = vpow2.f32 %v1813_v12  ;;  %v1531_v17 = vadd.f32 %v2001_v15, %v1435_v13  ;;  %v1525_v18 = vpop.f32.mrb[15].mxu1 }
 0x59e   : > { %2123 = vpow2.f32 %v1812_v14  ;;  %v1526_v19 = vadd.f32 %v1525_v18, %v1430_v16 }
 0x59f   : > { %v1815_v20 = vmul.f32 -1.442695, %v1531_v17 }
 0x5a0   : > { %v1814_v21 = vmul.f32 -1.442695, %v1526_v19 }
 0x5a1   : > { %2125 = vpow2.f32 %v1815_v20 }
 0x5a2   : > { %2127 = vpow2.f32 %v1814_v21 }
 0x5a7   : > { %v2122_v22 = vpop.eup %2121 }
 0x5a8   : > { %v2124_v23 = vpop.eup %2123  ;;  %v1547_v24 = vadd.f32 1.0, %v2122_v22 }
 0x5a9   : > { %v1546_v25 = vadd.f32 1.0, %v2124_v23 }
 0x5aa   : > { %2129 = vrcp.f32 %v1547_v24 }
 0x5ab   : > { %v2126_v26 = vpop.eup %2125  ;;  %2131 = vrcp.f32 %v1546_v25 }
 0x5ac   : > { %v2128_v27 = vpop.eup %2127  ;;  %v1549_v28 = vadd.f32 1.0, %v2126_v26 }
 0x5ad   : > { %v1548_v29 = vadd.f32 1.0, %v2128_v27 }
 0x5ae   : > { %2133 = vrcp.f32 %v1549_v28 }
 0x5af   : > { %2135 = vrcp.f32 %v1548_v29 }
 0x5b4   : > { %v2130_v30 = vpop.eup %2129 }
 0x5b5   : > { %v2132_v31 = vpop.eup %2131  ;;  %1559 = vst [vmem:[%s518_s4 + $0x8] sm:$0xff] %v2130_v30 }
 0x5b6   : > { %1558 = vst [vmem:[%s518_s4] sm:$0xff] %v2132_v31 }
 0x5b8   : > { %v2134_v32 = vpop.eup %2133 }
 0x5b9   : > { %v2136_v33 = vpop.eup %2135  ;;  %1561 = vst [vmem:[%s518_s4 + $0x18] sm:$0xff] %v2134_v32 }
 0x5ba   : > { %1560 = vst [vmem:[%s518_s4 + $0x10] sm:$0xff] %v2136_v33 }
 0x5bb   : > { %2206 = shalt.err (!%p2203_p3)
}
 0x5bc   : > { %s2207_s0 = scalar_lea.hbm %s2708_s15, 512  ;;  %s2211_s2 = scalar_lea.hbm %s2765_s11, 1024 }
 0x5bd   : > { %p2208_p4 = scmp.ne.s32.totalorder %s2708_s15, %s2207_s0  ;;  %p2212_p11 = scmp.lt.u32.totalorder %s2708_s15, %s2765_s11 }
 0x5be   : > { %p2213_p10 = scmp.lt.u32.totalorder %s2211_s2, %s2207_s0  ;;  %p2215_p12 = scmp.lt.u32.totalorder %s2207_s0, %s2708_s15 }
 0x5bf   : > { %p2209_p5 = pnand %p2208_p4, %p2377_p6 }
 0x5c0   : > { %p2214_p9 = por %p2213_p10, %p2212_p11 }
 0x5c1   : > { %p2210_p7 = pneg %p2209_p5 }
 0x5c2   : > { %p2216_p13 = por %p2215_p12, %p2214_p9 }
 0x5c4   : > { %p2217_p0 = pnand %p2216_p13, %p2210_p7 }
 0x5c6   : > { %2220 = shalt.err (!%p2217_p0)
}
 0x5c7   : > { %s2265_s17 = smov 128   ;;  %s2266_s30 = smov 256  }
 0x5c8   : > { %s2267_s29 = smov 8  }
 0x5c9   : > { %2064 = dma.vmem_to_hbm [thread:$0]  (%p2377_p6), %s2702_s3, 512, %s2708_s15, %s1565_s22, %s2265_s17, %s2266_s30, %s2267_s29  }
 0x5ca PF: > { %s1628_s1 = sand.u32 1, %s2247_s25   ;;  %p2783_p1 = scmp.ge.s32.totalorder %s2259_s28, 2 }
 0x5cb   : > { %s1629_s16 = scalar_lea.sflag [#allocation4], %s1628_s1 }
 0x5cc   : > { %p2071_p2 = pnand %p2783_p1, %p2383_p8 }
 0x5ce   : > { %2238 = dma.done.wait (!%p2071_p2), %s1629_s16, 512  }
 0x5cf   : > { %2240 = vsyncadd (!%p2071_p2), %s1629_s16, 4294966784  ;;  %s2784_s0 = sadd.s32 4294967294, %s2259_s28  }
 0x5d0   : > { %s1637_s21 = sand.u32 1, %s2784_s0  }
 0x5d1   : > { %s1638_s24 = scalar_lea.sflag [#allocation6], %s1637_s21 }
 0x5d2   : > { %2242 = dma.done.wait (!%p2071_p2), %s1638_s24, 256  }
 0x5d3   : > { %2244 = vsyncadd (!%p2071_p2), %s1638_s24, 4294967040  ;;  %s2785_s18 = sld [smem:[#allocation10_spill]]  ;;  %p27_p6 = scmp.ge.s32.totalorder %s2363_s14, 4  }
 0x5d4   : > { %s2786_s25 = smov %s2251_s26  ;;  %s2787_s26 = smov %s2255_s27 }
 0x5d5   : > { %s2789_s28 = smov %s2363_s14  ;;  %29 = sbr.rel (!%p27_p6) target bundleno = 11 (0xb), region = 180 }
 0x5d9   : > { %s2788_s27 = smov %s2785_s18 }
 0x5dc   :  { %1652 = vsyncpa [#allocation4], 1 }
 0x5dd   :  { %1654 = vsyncpa [#allocation4 + $0x1], 1 }
 0x5de   :  { %1655 = vsyncpa [#allocation6], 1 }
 0x5df   :  { %1657 = vsyncpa [#allocation6 + $0x1], 1 }

</bundles_post_ra>
